<compile_context>
chip_gen: v5e
topology: v5e:2x2
jax: 0.10.0
libtpu: 0.0.40
codegen_flags: <defaults>
</compile_context>

<pallas_src>
import jax
import jax.numpy as jnp
from jax import lax
from jax.experimental import pallas as pl
from jax.experimental.pallas import tpu as pltpu

# ---------------- small, TPU-friendly config (stand-in for CidadaoModelConfig) --
VOCAB_SIZE = 256      # config.vocab_size              (shrunk)
MAX_POS    = 64       # config.max_position_embeddings (shrunk)
HIDDEN     = 128      # config.hidden_size             (shrunk, lane-aligned)
LN_EPS     = 1e-5

TOK_TILE = 1024       # tokens per grid step (amortizes ~0.35 us/step overhead)
SUB_TILE = 256        # rows per inner sub-chunk (bounds vreg pressure)


def _round_up(x, m):
    return -(-x // m) * m


def _make_embed_ln_kernel(sub_rows, eps):
    def kernel(idx_ref,        # (tok_tile, 2) int32 VMEM: col0 = word id, col1 = pos id + VOCAB
               table_ref,      # (VOCAB + MAX_POS, H) VMEM (word table ++ pos table)
               gamma_ref,      # (1, H) f32 VMEM
               beta_ref,       # (1, H) f32 VMEM
               out_ref):       # (tok_tile, H) f32 VMEM
        tok_tile = idx_ref.shape[0]
        n_rows = table_ref.shape[0]
        hidden = table_ref.shape[1]
        n_sub = tok_tile // sub_rows

        # Hoisted per-tile constants (tiny; stay resident in vregs).
        gamma = gamma_ref[...].astype(jnp.float32)                 # (1, H)
        beta = beta_ref[...].astype(jnp.float32)                   # (1, H)
        col = lax.broadcasted_iota(jnp.int32, (1, n_rows), 1)      # (1, V+P) lane indices
        inv_h = jnp.float32(1.0 / hidden)

        def body(c, carry):
            r0 = pl.multiple_of(c * sub_rows, sub_rows)
            idx = idx_ref[pl.ds(r0, sub_rows), :]                  # (sub, 2) int32
            wid = idx[:, 0:1]                                      # (sub, 1)
            pid = idx[:, 1:2]                                      # (sub, 1), already +VOCAB

            # Combined one-hot: exactly two 1s per row (word row + shifted pos
            # row; ranges are disjoint so OR never collides).
            onehot = ((col == wid) | (col == pid)).astype(table_ref.dtype)

            # Single MXU gather + add with f32 accumulation (exact: 1.0 * v).
            x = jnp.dot(onehot, table_ref[...],
                        preferred_element_type=jnp.float32)        # (sub, H) f32

            # One-pass LayerNorm statistics (two independent XLU reduces).
            s1 = jnp.sum(x, axis=-1, keepdims=True)
            s2 = jnp.sum(x * x, axis=-1, keepdims=True)
            mean = s1 * inv_h
            var = s2 * inv_h - mean * mean
            x_hat = (x - mean) * lax.rsqrt(var + eps)

            out_ref[pl.ds(r0, sub_rows), :] = (
                x_hat * gamma + beta).astype(out_ref.dtype)
            return carry

        lax.fori_loop(0, n_sub, body, 0, unroll=True)

    return kernel


def transparency_embeddings(input_ids, word_table, pos_table, gamma, beta,
                            position_ids=None):
    """input_ids: (B, S) int32.  Returns (B, S, H) float32."""
    B, S = input_ids.shape
    V, H = word_table.shape

    if position_ids is None:
        position_ids = jnp.broadcast_to(
            jnp.arange(S, dtype=jnp.int32)[None, :], (B, S))

    n_tok = B * S

    # Tile sizing: large tiles amortize per-step overhead; small inputs get two
    # tiles so the "parallel" grid axis can still shard across 2 TCs (v7x).
    if n_tok >= 2 * TOK_TILE:
        tok_tile = TOK_TILE
    else:
        tok_tile = _round_up(max(8, -(-n_tok // 2)), 8)
        if tok_tile > SUB_TILE:
            tok_tile = _round_up(tok_tile, SUB_TILE)
    sub = min(SUB_TILE, tok_tile)            # tok_tile % sub == 0 by construction

    n_tiles = -(-n_tok // tok_tile)          # ceil-div
    n_pad = n_tiles * tok_tile

    ids_flat = input_ids.reshape(-1).astype(jnp.int32)
    pos_flat = position_ids.reshape(-1).astype(jnp.int32) + V   # shift into concat rows
    idx = jnp.stack([ids_flat, pos_flat], axis=-1)              # (n_tok, 2)
    if n_pad != n_tok:
        # Pad with row 0 (always valid); padded rows are sliced off below.
        idx = jnp.pad(idx, ((0, n_pad - n_tok), (0, 0)))

    table = jnp.concatenate([word_table, pos_table], axis=0)    # (V+P, H)
    gamma2 = gamma.reshape(1, H).astype(jnp.float32)
    beta2 = beta.reshape(1, H).astype(jnp.float32)

    grid_spec = pl.GridSpec(
        grid=(n_tiles,),
        in_specs=[
            pl.BlockSpec((tok_tile, 2), lambda i: (i, 0)),       # merged ids/pos
            pl.BlockSpec(table.shape, lambda i: (0, 0)),         # full table resident
            pl.BlockSpec((1, H), lambda i: (0, 0)),              # gamma
            pl.BlockSpec((1, H), lambda i: (0, 0)),              # beta
        ],
        out_specs=pl.BlockSpec((tok_tile, H), lambda i: (i, 0)),
    )

    out_flat = pl.pallas_call(
        _make_embed_ln_kernel(sub, LN_EPS),
        out_shape=jax.ShapeDtypeStruct((n_pad, H), jnp.float32),
        grid_spec=grid_spec,
        compiler_params=pltpu.CompilerParams(
            dimension_semantics=("parallel",)),   # tiles independent -> 2-TC shard
    )(idx, table, gamma2, beta2)

    return out_flat[:n_tok].reshape(B, S, H)


def _reference(input_ids, word_table, pos_table, gamma, beta):
    B, S = input_ids.shape
    pos_ids = jnp.broadcast_to(jnp.arange(S, dtype=jnp.int32)[None, :], (B, S))
    e = (word_table.astype(jnp.float32)[input_ids]
         + pos_table.astype(jnp.float32)[pos_ids])
    mean = jnp.mean(e, axis=-1, keepdims=True)
    var = jnp.mean((e - mean) ** 2, axis=-1, keepdims=True)
    x_hat = (e - mean) * lax.rsqrt(var + LN_EPS)
    return x_hat * gamma.reshape(1, 1, -1) + beta.reshape(1, 1, -1)


if __name__ == "__main__":
    key = jax.random.PRNGKey(0)
    k_word, k_pos, k_ids1, k_ids2 = jax.random.split(key, 4)

    # Deterministic synthetic parameters (PyTorch-style inits: N(0,1) embeddings,
    # LayerNorm weight=1 / bias=0).  Tables in f32 to match the f32 PyTorch
    # module exactly; pass bf16 tables on v6e/v7x if table traffic matters.
    word_table = jax.random.normal(k_word, (VOCAB_SIZE, HIDDEN), dtype=jnp.float32)
    pos_table = jax.random.normal(k_pos, (MAX_POS, HIDDEN), dtype=jnp.float32)
    gamma = jnp.ones((HIDDEN,), dtype=jnp.float32)
    beta = jnp.zeros((HIDDEN,), dtype=jnp.float32)

    # --- small case: exercises the 2-tile / single-sub-chunk path -------------
    B1, S1 = 2, 16
    ids1 = jax.random.randint(k_ids1, (B1, S1), 0, VOCAB_SIZE, dtype=jnp.int32)
    out1 = jax.block_until_ready(
        transparency_embeddings(ids1, word_table, pos_table, gamma, beta))
    ref1 = _reference(ids1, word_table, pos_table, gamma, beta)
    assert out1.shape == (B1, S1, HIDDEN)
    assert jnp.allclose(out1, ref1, atol=1e-4, rtol=1e-4), "small-case mismatch"

    # --- larger case: exercises TOK_TILE=1024, inner fori_loop and padding ----
    B2, S2 = 33, 64          # 2112 tokens -> 3 tiles of 1024 (960 padded rows)
    ids2 = jax.random.randint(k_ids2, (B2, S2), 0, VOCAB_SIZE, dtype=jnp.int32)
    out2 = jax.block_until_ready(
        transparency_embeddings(ids2, word_table, pos_table, gamma, beta))
    ref2 = _reference(ids2, word_table, pos_table, gamma, beta)
    assert out2.shape == (B2, S2, HIDDEN)
    assert jnp.allclose(out2, ref2, atol=1e-4, rtol=1e-4), "large-case mismatch"

    print("KERNEL_OK")
</pallas_src>

<mosaic_0001>
module attributes {stable_mosaic.version = 11 : i64} {
  func.func @kernel(%arg0: i32, %arg1: memref<16x2xi32, #tpu.memory_space<vmem>>, %arg2: memref<320x128xf32, #tpu.memory_space<vmem>>, %arg3: memref<1x128xf32, #tpu.memory_space<vmem>>, %arg4: memref<1x128xf32, #tpu.memory_space<vmem>>, %arg5: memref<16x128xf32, #tpu.memory_space<vmem>>) attributes {dimension_semantics = [#tpu.dimension_semantics<parallel>], iteration_bounds = array<i64: 2>, scalar_prefetch = 0 : i64, scratch_operands = 0 : i64, tpu.core_type = #tpu.core_type<tc>, window_params = [{transform_indices = @transform_0, window_bounds = array<i64: 16, 2>}, {pipeline_mode = #tpu.pipeline_mode<synchronous>, transform_indices = @transform_1, window_bounds = array<i64: 320, 128>}, {pipeline_mode = #tpu.pipeline_mode<synchronous>, transform_indices = @transform_2, window_bounds = array<i64: 1, 128>}, {pipeline_mode = #tpu.pipeline_mode<synchronous>, transform_indices = @transform_3, window_bounds = array<i64: 1, 128>}, {transform_indices = @transform_4, window_bounds = array<i64: 16, 128>}]} {
    %c0 = arith.constant 0 : index
    %c0_0 = arith.constant 0 : index
    %0 = vector.load %arg3[%c0, %c0_0] : memref<1x128xf32, #tpu.memory_space<vmem>>, vector<1x128xf32>
    %c0_1 = arith.constant 0 : index
    %c0_2 = arith.constant 0 : index
    %1 = vector.load %arg4[%c0_1, %c0_2] : memref<1x128xf32, #tpu.memory_space<vmem>>, vector<1x128xf32>
    %2 = tpu.iota {dimensions = array<i32: 1>} : vector<1x320xi32>
    %cst = arith.constant 7.812500e-03 : f32
    %c0_i32 = arith.constant 0 : i32
    %c16_i32 = arith.constant 16 : i32
    %3 = arith.muli %c0_i32, %c16_i32 : i32
    %4 = tpu.assume_multiple %3, 16 : i32
    %5 = arith.index_cast %4 : i32 to index
    %c0_3 = arith.constant 0 : index
    %6 = vector.load %arg1[%5, %c0_3] : memref<16x2xi32, #tpu.memory_space<vmem>>, vector<16x2xi32>
    %7 = vector.extract_strided_slice %6 {offsets = [0, 0], sizes = [16, 1], strides = [1, 1]} : vector<16x2xi32> to vector<16x1xi32>
    %8 = vector.extract_strided_slice %6 {offsets = [0, 1], sizes = [16, 1], strides = [1, 1]} : vector<16x2xi32> to vector<16x1xi32>
    %9 = vector.broadcast %2 : vector<1x320xi32> to vector<16x320xi32>
    %10 = vector.broadcast %7 : vector<16x1xi32> to vector<16x320xi32>
    %11 = arith.cmpi eq, %9, %10 : vector<16x320xi32>
    %12 = vector.broadcast %2 : vector<1x320xi32> to vector<16x320xi32>
    %13 = vector.broadcast %8 : vector<16x1xi32> to vector<16x320xi32>
    %14 = arith.cmpi eq, %12, %13 : vector<16x320xi32>
    %15 = arith.ori %11, %14 : vector<16x320xi1>
    %16 = arith.extui %15 : vector<16x320xi1> to vector<16x320xi32>
    %17 = arith.sitofp %16 : vector<16x320xi32> to vector<16x320xf32>
    %c0_4 = arith.constant 0 : index
    %c0_5 = arith.constant 0 : index
    %18 = vector.load %arg2[%c0_4, %c0_5] : memref<320x128xf32, #tpu.memory_space<vmem>>, vector<320x128xf32>
    %cst_6 = arith.constant dense<0.000000e+00> : vector<16x128xf32>
    %19 = tpu.matmul %17, %18, %cst_6 {dimension_numbers = #tpu.dot_dimension_numbers<[1], [0], [0], [1], [0, 0, 1, 1], [], []>} : vector<16x320xf32>, vector<320x128xf32>, vector<16x128xf32> -> vector<16x128xf32>
    %cst_7 = arith.constant dense<0.000000e+00> : vector<16xf32>
    %20 = vector.multi_reduction <add>, %19, %cst_7 [1] : vector<16x128xf32> to vector<16xf32>
    %21 = vector.shape_cast %20 : vector<16xf32> to vector<16x1xf32>
    %22 = arith.mulf %19, %19 : vector<16x128xf32>
    %cst_8 = arith.constant dense<0.000000e+00> : vector<16xf32>
    %23 = vector.multi_reduction <add>, %22, %cst_8 [1] : vector<16x128xf32> to vector<16xf32>
    %24 = vector.shape_cast %23 : vector<16xf32> to vector<16x1xf32>
    %25 = vector.broadcast %cst : f32 to vector<16x1xf32>
    %26 = arith.mulf %21, %25 : vector<16x1xf32>
    %27 = vector.broadcast %cst : f32 to vector<16x1xf32>
    %28 = arith.mulf %24, %27 : vector<16x1xf32>
    %29 = arith.mulf %26, %26 : vector<16x1xf32>
    %30 = arith.subf %28, %29 : vector<16x1xf32>
    %31 = vector.broadcast %26 : vector<16x1xf32> to vector<16x128xf32>
    %32 = arith.subf %19, %31 : vector<16x128xf32>
    %cst_9 = arith.constant 9.99999974E-6 : f32
    %33 = vector.broadcast %cst_9 : f32 to vector<16x1xf32>
    %34 = arith.addf %30, %33 : vector<16x1xf32>
    %35 = math.rsqrt %34 : vector<16x1xf32>
    %36 = vector.broadcast %35 : vector<16x1xf32> to vector<16x128xf32>
    %37 = arith.mulf %32, %36 : vector<16x128xf32>
    %38 = vector.broadcast %0 : vector<1x128xf32> to vector<16x128xf32>
    %39 = arith.mulf %37, %38 : vector<16x128xf32>
    %40 = vector.broadcast %1 : vector<1x128xf32> to vector<16x128xf32>
    %41 = arith.addf %39, %40 : vector<16x128xf32>
    %42 = arith.index_cast %4 : i32 to index
    %c0_10 = arith.constant 0 : index
    %43 = vector.load %arg5[%42, %c0_10] : memref<16x128xf32, #tpu.memory_space<vmem>>, vector<16x128xf32>
    tpu.vector_store %arg5[%42, %c0_10], %41 {strides = array<i32>} : memref<16x128xf32, #tpu.memory_space<vmem>>, vector<16x128xf32>,
    %c1_i32 = arith.constant 1 : i32
    return
  }
  func.func @transform_0(%arg0: i32) -> (i32, i32) {
    %c0_i32 = arith.constant 0 : i32
    %c0_i32_0 = arith.constant 0 : i32
    return %arg0, %c0_i32 : i32, i32
  }
  func.func @transform_1(%arg0: i32) -> (i32, i32) {
    %c0_i32 = arith.constant 0 : i32
    %c0_i32_0 = arith.constant 0 : i32
    %c0_i32_1 = arith.constant 0 : i32
    return %c0_i32, %c0_i32_0 : i32, i32
  }
  func.func @transform_2(%arg0: i32) -> (i32, i32) {
    %c0_i32 = arith.constant 0 : i32
    %c0_i32_0 = arith.constant 0 : i32
    %c0_i32_1 = arith.constant 0 : i32
    return %c0_i32, %c0_i32_0 : i32, i32
  }
  func.func @transform_3(%arg0: i32) -> (i32, i32) {
    %c0_i32 = arith.constant 0 : i32
    %c0_i32_0 = arith.constant 0 : i32
    %c0_i32_1 = arith.constant 0 : i32
    return %c0_i32, %c0_i32_0 : i32, i32
  }
  func.func @transform_4(%arg0: i32) -> (i32, i32) {
    %c0_i32 = arith.constant 0 : i32
    %c0_i32_0 = arith.constant 0 : i32
    return %arg0, %c0_i32 : i32, i32
  }
}

</mosaic_0001>

<bundles_post_ra>
// kernel: tpu_custom_call.1
= control target key start
LH: loop header
LB: loop body
LE: loop exit
PB: predicated region body
PF: predicated region fallthrough
CT: control target
= control target key end

     0   :  { %9 = vsyncpa [#allocation3], 0  ;;  %s875_s0 = inlined_call_operand.vmem [shape: s32[32,2], index: 0, kind: input, shape index: {}]   ;;  %s876_s1 = inlined_call_operand.hbm [shape: f32[320,128], index: 1, kind: input, shape index: {}]   ;;  %s877_s2 = inlined_call_operand.vmem [shape: f32[1,128], index: 2, kind: input, shape index: {}]   ;;  %s878_s3 = inlined_call_operand.vmem [shape: f32[1,128], index: 3, kind: input, shape index: {}]   ;;  %s879_s4 = inlined_call_operand.hbm [shape: f32[32,128], index: 4, kind: output, shape index: {}]  }
   0x1   :  { %10 = vsyncpa [#allocation4], 0 }
   0x2   :  { %12 = vsyncpa [#allocation4 + $0x1], 0  ;;  %s771_s15 = smov 0   ;;  %s773_s16 = smov 0  }
   0x3   :  { %s775_s17 = smov 0   ;;  %s777_s18 = smov 0  }
   0x4 LB: > { %s792_s19 = sadd.s32 4294967295, %s735_s18   ;;  %s528_s20 = sadd.s32 4294967294, %s735_s18   ;;  %s735_s18 = sphi %s777_s18, %s885_s18   ;;  %s731_s17 = sphi %s775_s17, %s884_s17   ;;  %s727_s16 = sphi %s773_s16, %s883_s16   ;;  %s723_s15 = sphi %s771_s15, %s882_s15  }
   0x5   : > { %s796_s21 = sadd.s32 1, %s735_s18   ;;  %s114_s22 = sadd.s32 1, %s731_s17 }
   0x6   : > { %s111_s23 = ssub.s32 %s735_s18, %s796_s21  ;;  %p124_p0 = scmp.ne.s32.totalorder %s731_s17, %s727_s16 }
   0x7   : > { %p112_p1 = scmp.eq.s32.totalorder %s111_s23, 0  ;;  %p125_p2 = scmp.eq.s32.totalorder %s792_s19, 1 }
   0x8   : > { %p130_p3 = scmp.ne.s32.totalorder %s727_s16, %s723_s15  ;;  %p131_p4 = scmp.eq.s32.totalorder %s528_s20, 1 }
   0x9   : > { %s807_s24 = scalar_select %p112_p1, %s731_s17, %s114_s22  }
   0xa   : > { %p809_p5 = por %p125_p2, %p124_p0  ;;  %p813_p6 = por %p131_p4, %p130_p3 }
   0xb   : > { %p529_p7 = scmp.ge.s32.totalorder %s735_s18, 1  ;;  %p138_p8 = scmp.lt.s32.totalorder %s735_s18, 3 }
   0xc   : > { %p585_p9 = scmp.eq.s32.totalorder %s792_s19, 0  ;;  %s149_s29 = sshll.u32 %s876_s1, 4  ;;  %s150_s29 = int_to_ptr.hbm [resolvable:$true] %s149_s29 }
   0xd   : > { %p139_p10 = pnand %p529_p7, %p138_p8  ;;  %s737_s30 = smov [#allocation2]  }
   0xe   : > { %s151_s5 = sshll.u32 %s737_s30, 4  ;;  %s738_s6 = smov 128   ;;  %s152_s5 = int_to_ptr.vmem [resolvable:$true] %s151_s5 }
   0xf   : > { %p577_p11 = pneg %p139_p10  ;;  %s739_s7 = smov 8  }
  0x10   : > { %182 = sbr.rel (%p139_p10) target bundleno = 459 (0x1cb), region = 36 }
  0x11   : > { %p578_p12 = pnand %p585_p9, %p577_p11 }
  0x13   : > { %580 = dma.hbm_to_vmem [thread:$0]  (!%p578_p12), %s150_s29, 5120, %s152_s5, [#allocation3], %s738_s6, %s738_s6, %s739_s7  }
  0x15   : > { %714 = dma.done.wait (%p585_p9), [#allocation3], 5120  }
  0x16   : > { %716 = vsyncadd (%p585_p9), [#allocation3], 4294962176  ;;  %s535_s8 = sshll.u32 %s792_s19, 1  ;;  %v740_v0 = vmov 0   ;;  %v281_v3 = vld [vmem:[#allocation2 + $0x78] sm:$0xff]  ;;  %v280_v5 = vld [vmem:[#allocation2 + $0x70] sm:$0xff]  ;;  %v218_v44 = vlaneseq }
  0x17   : > { %631 = vset.pattern.permute.xlu1 %v740_v0  ;;  %629 = vset.pattern.permute.xlu0 %v740_v0  ;;  %p210_p13 = scmp.lt.s32.totalorder %s535_s8, 3  ;;  %v297_v4 = vld [vmem:[#allocation2 + $0xf8] sm:$0xff]  ;;  %v296_v6 = vld [vmem:[#allocation2 + $0xf0] sm:$0xff]  ;;  %v279_v7 = vld [vmem:[#allocation2 + $0x68] sm:$0xff]  ;;  %v741_v13 = vmov 1   ;;  %v742_v52 = vmov 1.0  }
  0x18   : > { %313 = vmatpush.msra.mxu0 %v281_v3  ;;  %555 = vmatpush.msra.mxu3 %v281_v3  ;;  %v295_v8 = vld [vmem:[#allocation2 + $0xe8] sm:$0xff]  ;;  %v278_v9 = vld [vmem:[#allocation2 + $0x60] sm:$0xff]  ;;  %v305_v10 = vld [vmem:[#allocation2 + $0x138] sm:$0xff]  ;;  %v219_v47 = vand.u32 127, %v218_v44  ;;  %vm306_vm11 = vcmask 523264   ;;  %v743_v53 = vmov 0.0  }
  0x19   : > { %s887_s8 = smov (!%p210_p13, %s535_s8), 3  ;;  %336 = vmatpush.msra.mxu1 %v297_v4  ;;  %v294_v11 = vld [vmem:[#allocation2 + $0xe0] sm:$0xff]  ;;  %367 = vmatpush.msra.mxu2 %v305_v10  ;;  %v277_v12 = vld [vmem:[#allocation2 + $0x58] sm:$0xff]  ;;  %v304_v14 = vld [vmem:[#allocation2 + $0x130] sm:$0xff]  ;;  %s206_s13 = sand.u32 1, %s727_s16  }
  0x1a   : > { %s536_s9 = sshll.u32 %s887_s8, 3  ;;  %314 = vmatpush.msra.mxu0 %v280_v5  ;;  %556 = vmatpush.msra.mxu3 %v280_v5  ;;  %v293_v15 = vld [vmem:[#allocation2 + $0xd8] sm:$0xff]  ;;  %v276_v16 = vld [vmem:[#allocation2 + $0x50] sm:$0xff]  ;;  %v275_v18 = vld [vmem:[#allocation2 + $0x48] sm:$0xff]  ;;  %v220_v48 = vadd.s32 128, %v219_v47  ;;  %v221_v49 = vadd.s32 256, %v219_v47 }
  0x1b   : > { %s213_s12 = scalar_lea.vmem %s875_s0, %s536_s9  ;;  %337 = vmatpush.msra.mxu1 %v296_v6  ;;  %v292_v17 = vld [vmem:[#allocation2 + $0xd0] sm:$0xff]  ;;  %368 = vmatpush.msra.mxu2 %v304_v14  ;;  %v291_v19 = vld [vmem:[#allocation2 + $0xc8] sm:$0xff]  ;;  %v274_v20 = vld [vmem:[#allocation2 + $0x40] sm:$0xff]  ;;  %s534_s27 = sshll.u32 %s206_s13, 4 }
  0x1c   : > { %v223_v1 = vld [vmem:[%s213_s12 + $0x8] sm:$0xff]  ;;  %v222_v2 = vld [vmem:[%s213_s12] sm:$0xff]  ;;  %315 = vmatpush.msra.mxu0 %v279_v7  ;;  %557 = vmatpush.msra.mxu3 %v279_v7  ;;  %v273_v22 = vld [vmem:[#allocation2 + $0x38] sm:$0xff]  ;;  %s208_s28 = scalar_lea.vmem [#allocation5], %s534_s27  ;;  %s554_s29 = sshll.u32 %s792_s19, 4 }
  0x1d   : > { %228 = vperm.xlu1 %631, %v223_v1   ;;  %225 = vperm.xlu0 %629, %v222_v2   ;;  %v290_v21 = vld [vmem:[#allocation2 + $0xc0] sm:$0xff]  ;;  %v289_v23 = vld [vmem:[#allocation2 + $0xb8] sm:$0xff]  ;;  %v272_v24 = vld [vmem:[#allocation2 + $0x30] sm:$0xff]  ;;  %s450_s6 = scalar_lea.hbm %s879_s4, %s554_s29  ;;  %s451_s7 = sshll.u32 %s208_s28, 4  ;;  %s452_s7 = int_to_ptr.vmem [resolvable:$true] %s451_s7 }
  0x1e   : > { %338 = vmatpush.msra.mxu1 %v295_v8  ;;  %316 = vmatpush.msra.mxu0 %v278_v9  ;;  %v288_v25 = vld [vmem:[#allocation2 + $0xb0] sm:$0xff]  ;;  %v271_v26 = vld [vmem:[#allocation2 + $0x28] sm:$0xff]  ;;  %v270_v29 = vld [vmem:[#allocation2 + $0x20] sm:$0xff]  ;;  %s453_s8 = sshll.u32 %s450_s6, 4  ;;  %s439_s19 = scalar_lea.sflag [#allocation4], %s206_s13  ;;  %s454_s8 = int_to_ptr.hbm [resolvable:$true] %s453_s8 }
  0x1f   : > { %558 = vmatpush.msra.mxu3 %v278_v9  ;;  %v287_v27 = vld [vmem:[#allocation2 + $0xa8] sm:$0xff]  ;;  %v286_v30 = vld [vmem:[#allocation2 + $0xa0] sm:$0xff]  ;;  %v269_v32 = vld [vmem:[#allocation2 + $0x18] sm:$0xff]  ;;  %s683_s9 = sshra.s32 %s454_s8, 4  ;;  %s689_s14 = scalar_lea.hbm %s879_s4, 32  ;;  %s684_s9 = int_to_ptr.hbm [resolvable:$true] %s683_s9 }
  0x20   : > { %339 = vmatpush.msra.mxu1 %v294_v11  ;;  %317 = vmatpush.msra.mxu0 %v277_v12  ;;  %v303_v28 = vld [vmem:[#allocation2 + $0x128] sm:$0xff]  ;;  %v302_v31 = vld [vmem:[#allocation2 + $0x120] sm:$0xff]  ;;  %v285_v33 = vld [vmem:[#allocation2 + $0x98] sm:$0xff]  ;;  %s685_s10 = scalar_lea.hbm %s684_s9, 16  ;;  %p690_p3 = scmp.lt.s32.totalorder %s684_s9, %s879_s4 }
  0x21   : > { %559 = vmatpush.msra.mxu3 %v277_v12  ;;  %369 = vmatpush.msra.mxu2 %v303_v28  ;;  %v301_v34 = vld [vmem:[#allocation2 + $0x118] sm:$0xff]  ;;  %v268_v35 = vld [vmem:[#allocation2 + $0x10] sm:$0xff]  ;;  %v267_v38 = vld [vmem:[#allocation2 + $0x8] sm:$0xff]  ;;  %p686_p0 = scmp.ne.s32.totalorder %s684_s9, %s685_s10  ;;  %p691_p4 = scmp.lt.s32.totalorder %s689_s14, %s685_s10 }
  0x22   : > { %340 = vmatpush.msra.mxu1 %v293_v15  ;;  %318 = vmatpush.msra.mxu0 %v276_v16  ;;  %v284_v36 = vld [vmem:[#allocation2 + $0x90] sm:$0xff]  ;;  %v283_v39 = vld [vmem:[#allocation2 + $0x88] sm:$0xff]  ;;  %v266_v41 = vld [vmem:[#allocation2] sm:$0xff] }
  0x23   : > { %560 = vmatpush.msra.mxu3 %v276_v16  ;;  %370 = vmatpush.msra.mxu2 %v302_v31  ;;  %v300_v37 = vld [vmem:[#allocation2 + $0x110] sm:$0xff]  ;;  %v299_v40 = vld [vmem:[#allocation2 + $0x108] sm:$0xff]  ;;  %v282_v42 = vld [vmem:[#allocation2 + $0x80] sm:$0xff]  ;;  %p687_p1 = pnand %p686_p0, %p809_p5  ;;  %p692_p7 = por %p691_p4, %p690_p3 }
  0x24   : > { %341 = vmatpush.msra.mxu1 %v292_v17  ;;  %319 = vmatpush.msra.mxu0 %v275_v18  ;;  %v298_v43 = vld [vmem:[#allocation2 + $0x100] sm:$0xff] }
  0x25   : > { %632 = vset.pattern.permute.xlu1 %v741_v13  ;;  %630 = vset.pattern.permute.xlu0 %v741_v13  ;;  %v634_v28 = vld [vmem:[%s878_s3] ss:$0 sm:$0xff]  ;;  %p688_p2 = pneg %p687_p1 }
  0x26   : > { %240 = vperm.xlu1 %632, %v223_v1   ;;  %237 = vperm.xlu0 %630, %v222_v2  }
  0x27   : > { %561 = vmatpush.msra.mxu3 %v275_v18  ;;  %342 = vmatpush.msra.mxu1 %v291_v19  ;;  %p693_p8 = pnand %p692_p7, %p688_p2 }
  0x28   : > { %320 = vmatpush.msra.mxu0 %v274_v20  ;;  %371 = vmatpush.msra.mxu2 %v301_v34 }
  0x29   : > { %562 = vmatpush.msra.mxu3 %v274_v20  ;;  %343 = vmatpush.msra.mxu1 %v290_v21 }
  0x2a   : > { %321 = vmatpush.msra.mxu0 %v273_v22  ;;  %372 = vmatpush.msra.mxu2 %v300_v37 }
  0x2b   : > { %563 = vmatpush.msra.mxu3 %v273_v22  ;;  %344 = vmatpush.msra.mxu1 %v289_v23 }
  0x2c   : > { %322 = vmatpush.msra.mxu0 %v272_v24  ;;  %373 = vmatpush.msra.mxu2 %v299_v40 }
  0x2d   : > { %564 = vmatpush.msra.mxu3 %v272_v24  ;;  %345 = vmatpush.msra.mxu1 %v288_v25  ;;  %v633_v25 = vld [vmem:[%s877_s2] ss:$0 sm:$0xff] }
  0x2e   : > { %323 = vmatpush.msra.mxu0 %v271_v26  ;;  %374 = vmatpush.msra.mxu2 %v298_v43 }
  0x2f   : > { %565 = vmatpush.msra.mxu3 %v271_v26  ;;  %346 = vmatpush.msra.mxu1 %v287_v27 }
  0x30   : > { %324 = vmatpush.msra.mxu0 %v270_v29 }
  0x31   : > { %566 = vmatpush.msra.mxu3 %v270_v29  ;;  %347 = vmatpush.msra.mxu1 %v286_v30 }
  0x32   : > { %325 = vmatpush.msra.mxu0 %v269_v32 }
  0x33   : > { %567 = vmatpush.msra.mxu3 %v269_v32  ;;  %348 = vmatpush.msra.mxu1 %v285_v33 }
  0x34   : > { %326 = vmatpush.msra.mxu0 %v268_v35 }
  0x35   : > { %568 = vmatpush.msra.mxu3 %v268_v35  ;;  %349 = vmatpush.msra.mxu1 %v284_v36 }
  0x36   : > { %327 = vmatpush.msra.mxu0 %v267_v38 }
  0x37   : > { %569 = vmatpush.msra.mxu3 %v267_v38  ;;  %350 = vmatpush.msra.mxu1 %v283_v39 }
  0x38   : > { %328 = vmatpush.msra.mxu0 %v266_v41 }
  0x39   : > { %570 = vmatpush.msra.mxu3 %v266_v41  ;;  %351 = vmatpush.msra.mxu1 %v282_v42 }
  0x8f   : > { %v226_v45 = vpop.permute.xlu0 %225  ;;  %v229_v46 = vpop.permute.xlu1 %228 }
  0x90   : > { %vm230_vm2 = vcmp.eq.s32.totalorder %v219_v47, %v226_v45  ;;  %vm233_vm5 = vcmp.eq.s32.totalorder %v219_v47, %v229_v46  ;;  %vm231_vm8 = vcmp.eq.s32.totalorder %v220_v48, %v226_v45  ;;  %vm232_vm9 = vcmp.eq.s32.totalorder %v221_v49, %v226_v45 }
  0x91   : > { %vm235_vm15 = vcmp.eq.s32.totalorder %v221_v49, %v229_v46 }
  0x98   : > { %v241_v50 = vpop.permute.xlu1 %240  ;;  %v238_v51 = vpop.permute.xlu0 %237 }
  0x99   : > { %vm242_vm0 = vcmp.eq.s32.totalorder %v219_v47, %v238_v51  ;;  %vm243_vm1 = vcmp.eq.s32.totalorder %v220_v48, %v238_v51  ;;  %vm244_vm3 = vcmp.eq.s32.totalorder %v221_v49, %v238_v51  ;;  %vm245_vm6 = vcmp.eq.s32.totalorder %v219_v47, %v241_v50 }
  0x9a   : > { %vm248_vm4 = vmor %vm230_vm2, %vm242_vm0  ;;  %vm247_vm13 = vcmp.eq.s32.totalorder %v221_v49, %v241_v50  ;;  %vm246_vm14 = vcmp.eq.s32.totalorder %v220_v48, %v241_v50  ;;  %vm234_vm0 = vcmp.eq.s32.totalorder %v220_v48, %v229_v46 }
  0x9b   : > { %543 = vmatmul.msk.f32.vlgmr.msra.gmra.mxu0 %vm248_vm4, %v742_v52  ;;  %vm251_vm7 = vmor %vm233_vm5, %vm245_vm6 }
  0x9c   : > { %544 = vmatmul.msk.f32.vlgmr.msra.gmra.mxu3 %vm251_vm7, %v742_v52  ;;  %vm249_vm10 = vmor %vm231_vm8, %vm243_vm1 }
  0x9d   : > { %545 = vmatmul.msk.f32.vlgmr.msra.gmra.mxu1 %vm249_vm10, %v742_v52  ;;  %vm250_vm12 = vmor %vm232_vm9, %vm244_vm3 }
  0x9e   : > { %v539_v54 = vsel %vm250_vm12, 1.0, %v743_v53  ;;  %vm253_vm2 = vmor %vm235_vm15, %vm247_vm13 }
  0x9f   : > { %547 = vmatmul.msk.f32.vlgmr.msra.gmra.mxu2 %vm306_vm11, %v539_v54  ;;  %vm252_vm4 = vmor %vm234_vm0, %vm246_vm14  ;;  %v542_v55 = vsel %vm253_vm2, 1.0, %v743_v53 }
  0xa5   : > { %546 = vmatmul.msk.f32.gmra.mxu1 %vm252_vm4, %v742_v52 }
  0xa7   : > { %548 = vmatmul.msk.f32.gmra.mxu2 %vm306_vm11, %v542_v55 }
 0x118   : > { %v330_v57 = vpop.f32.mrf.mxu0 }
 0x11a   : > { %v353_v56 = vpop.f32.mrf.mxu1 }
 0x11b   : > { %v354_v58 = vadd.f32 %v353_v56, %v330_v57 }
 0x11f   : > { %v333_v63 = vpop.f32.mrf.mxu3 }
 0x122   : > { %v376_v59 = vpop.f32.mrf.mxu2  ;;  %v356_v62 = vpop.f32.mrf.mxu1 }
 0x123   : > { %v377_v60 = vadd.f32 %v376_v59, %v354_v58  ;;  %v357_v0 = vadd.f32 %v356_v62, %v333_v63 }
 0x125   : > { %382 = vadd.xlane.f32.xlu2 %v377_v60  ;;  %v386_v61 = vmul.f32 %v377_v60, %v377_v60 }
 0x127   : > { %388 = vadd.xlane.f32.xlu1 %v386_v61 }
 0x12a   : > { %v379_v1 = vpop.f32.mrf.mxu2 }
 0x12b   : > { %v380_v2 = vadd.f32 %v379_v1, %v357_v0 }
 0x12d   : > { %384 = vadd.xlane.f32.xlu2 %v380_v2  ;;  %v387_v3 = vmul.f32 %v380_v2, %v380_v2 }
 0x135   : > { %390 = vadd.xlane.f32.xlu2 %v387_v3 }
 0x198   : > { %v383_v4 = vpop.xlane.xlu2 %382 }
 0x199   : > { %v392_v5 = vmul.f32 0.0078125, %v383_v4 }
 0x19a   : > { %v389_v6 = vpop.xlane.xlu1 %388 }
 0x19b   : > { %v396_v7 = vmul.f32 %v392_v5, %v392_v5  ;;  %v394_v8 = vmul.f32 0.0078125, %v389_v6  ;;  %v400_v24 = vsub.f32 %v377_v60, %v392_v5 }
 0x19d   : > { %v398_v9 = vsub.f32 %v394_v8, %v396_v7 }
 0x19f   : > { %v402_v10 = vadd.f32 1e-05, %v398_v9 }
 0x1a0   : > { %v385_v11 = vpop.xlane.xlu2 %384 }
 0x1a1   : > { %635 = vrsqrt.f32 %v402_v10  ;;  %v393_v12 = vmul.f32 0.0078125, %v385_v11  ;;  %vm410_vm3 = vweird.f32 %v402_v10 }
 0x1a3   : > { %v397_v16 = vmul.f32 %v393_v12, %v393_v12  ;;  %v401_v37 = vsub.f32 %v380_v2, %v393_v12 }
 0x1a7   : > { %v636_v13 = vpop.eup %635 }
 0x1a8   : > { %v405_v14 = vmul.f32 %v636_v13, %v402_v10  ;;  %v391_v15 = vpop.xlane.xlu2 %390  ;;  %vm411_vm1 = vweird.f32 %v636_v13 }
 0x1a9   : > { %v395_v17 = vmul.f32 0.0078125, %v391_v15  ;;  %vm412_vm5 = vmor %vm410_vm3, %vm411_vm1 }
 0x1aa   : > { %v406_v18 = vmul.f32 %v636_v13, %v405_v14 }
 0x1ab   : > { %v399_v19 = vsub.f32 %v395_v17, %v397_v16 }
 0x1ac   : > { %v407_v20 = vmul.f32 0.5, %v406_v18 }
 0x1ad   : > { %v403_v21 = vadd.f32 1e-05, %v399_v19 }
 0x1ae   : > { %v408_v22 = vsub.f32 1.5, %v407_v20 }
 0x1af   : > { %637 = vrsqrt.f32 %v403_v21  ;;  %vm420_vm7 = vweird.f32 %v403_v21 }
 0x1b0   : > { %v409_v23 = vmul.f32 %v636_v13, %v408_v22 }
 0x1b2   : > { %v413_v26 = vsel %vm412_vm5, %v636_v13, %v409_v23 }
 0x1b3   : > { %v424_v27 = vmul.f32 %v413_v26, %v400_v24 }
 0x1b5   : > { %v638_v29 = vpop.eup %637  ;;  %v429_v30 = vmul.f32 %v633_v25, %v424_v27 }
 0x1b6   : > { %v415_v31 = vmul.f32 %v638_v29, %v403_v21  ;;  %vm421_vm6 = vweird.f32 %v638_v29 }
 0x1b7   : > { %v434_v32 = vadd.f32 %v634_v28, %v429_v30  ;;  %vm422_vm8 = vmor %vm420_vm7, %vm421_vm6 }
 0x1b8   : > { %v416_v33 = vmul.f32 %v638_v29, %v415_v31 }
 0x1b9   : > { %436 = vst [vmem:[%s208_s28] sm:$0xff] %v434_v32 }
 0x1ba   : > { %v417_v34 = vmul.f32 0.5, %v416_v33 }
 0x1bc   : > { %v418_v35 = vsub.f32 1.5, %v417_v34 }
 0x1be   : > { %v419_v36 = vmul.f32 %v638_v29, %v418_v35 }
 0x1c0   : > { %v423_v38 = vsel %vm422_vm8, %v638_v29, %v419_v36 }
 0x1c1   : > { %v425_v39 = vmul.f32 %v423_v38, %v401_v37 }
 0x1c3   : > { %v430_v40 = vmul.f32 %v633_v25, %v425_v39 }
 0x1c5   : > { %v435_v41 = vadd.f32 %v634_v28, %v430_v40 }
 0x1c7   : > { %437 = vst [vmem:[%s208_s28 + $0x8] sm:$0xff] %v435_v41 }
 0x1c8   : > { %696 = shalt.err (!%p693_p8)
}
 0x1c9   : > { %s744_s13 = smov 128   ;;  %s745_s23 = smov 8  }
 0x1ca   : > { %575 = dma.vmem_to_hbm [thread:$0]  (%p809_p5), %s452_s7, 256, %s454_s8, %s439_s19, %s744_s13, %s744_s13, %s745_s23  }
 0x1cb PF: > { %p587_p9 = scmp.ge.s32.totalorder %s735_s18, 2  ;;  %s468_s27 = sand.u32 1, %s723_s15  }
 0x1cc   : > { %s469_s28 = scalar_lea.sflag [#allocation4], %s468_s27 }
 0x1cd   : > { %p582_p10 = pnand %p587_p9, %p813_p6 }
 0x1cf   : > { %p583_p11 = pneg %p582_p10 }
 0x1d1   : > { %718 = dma.done.wait (%p583_p11), %s469_s28, 256  }
 0x1d2   : > { %720 = vsyncadd (%p583_p11), %s469_s28, 4294967040  ;;  %p15_p12 = scmp.ge.s32.totalorder %s796_s21, 4   ;;  %s882_s15 = smov %s727_s16 }
 0x1d3   : > { %s883_s16 = smov %s731_s17  ;;  %s884_s17 = smov %s807_s24 }
 0x1d4   : > { %s885_s18 = smov %s796_s21  ;;  %17 = sbr.rel (!%p15_p12) target bundleno = 4 (0x4), region = 76 }
 0x1d9   :  { %475 = vsyncpa [#allocation3], 1 }
 0x1da   :  { %477 = vsyncpa [#allocation3 + $0x1], 1 }
 0x1db   :  { %478 = vsyncpa [#allocation4], 1 }
 0x1dc   :  { %480 = vsyncpa [#allocation4 + $0x1], 1 }

</bundles_post_ra>
